<compile_context>
chip_gen: v7x
topology: tpu7x:2x2x1
jax: 0.10.0
libtpu: 0.0.40
codegen_flags: <defaults>
</compile_context>

<pallas_src>
import jax
import jax.numpy as jnp
from jax.experimental import pallas as pl
from jax.experimental.pallas import tpu as pltpu


def _cdiv(a, b):
    return -(-a // b)


def _round_up(a, b):
    return _cdiv(a, b) * b


def _partial8(x):
    # (B, ts, 128) f32 -> (8, 128): leading-axis reductions only (pure VALU
    # adds, lane axis stays dense).  Final 8->1 / cross-lane sums are done in
    # the wrapper.
    s = jnp.sum(x, axis=0)                          # (ts, 128)
    return jnp.sum(s.reshape(-1, 8, 128), axis=0)   # (8, 128)


def _loc_loss_kernel(tgt0_ref, inp_ref, tgtc_ref, out_ref):
    # tgt0_ref : (B, 1, tile_s, 128) target channel 0 (objectness), native dtype
    # inp_ref  : (B, 1, tile_s, 128) prediction channel c+1
    # tgtc_ref : (B, 1, tile_s, 128) target channel c+1
    # out_ref  : (1, 2, 8, 128) f32 partials: [0]=squared error, [1]=mask sum
    f32 = jnp.float32
    c = pl.program_id(1)                 # inner reduction axis: 0..3 -> ch 1..4

    t0 = tgt0_ref[:, 0].astype(f32)                          # (B, ts, 128)
    mask = jnp.where(t0 == 1.0, t0, 0.0)                     # exact-1.0 test

    t = tgtc_ref[:, 0].astype(f32)
    p = inp_ref[:, 0].astype(f32) * mask
    # box channels (grid steps 2,3 == channels 3,4): zero prediction where
    # the target box value is exactly 0
    p = jnp.where(jnp.logical_and(c >= 2, t == 0.0), 0.0, p)
    d = p - t
    sq_part = _partial8(d * d)                               # (8, 128)

    @pl.when(c == 0)
    def _():
        out_ref[0, 0] = sq_part
        out_ref[0, 1] = _partial8(mask)

    @pl.when(c > 0)
    def _():
        out_ref[0, 0] = out_ref[0, 0] + sq_part


def localization_loss(inp, tgt, weight=1.0):
    """Pallas implementation of LocalizationLoss.forward (returns a scalar)."""
    assert inp.shape == tgt.shape
    B, C, H, W = inp.shape
    assert C >= 5

    L = 128
    HW = H * W
    S = _cdiv(HW, L)
    itemsize = jnp.dtype(inp.dtype).itemsize

    # --- Generation-aware tiling -------------------------------------------
    kind = ""
    try:
        kind = jax.devices()[0].device_kind.lower()
    except Exception:
        pass
    is_v7 = ("v7" in kind) or (kind == "")        # unknown -> conservative
    # per-channel input block budget: 3 inputs x 2 pipeline buffers + f32
    # temporaries must stay within v7x's 64 MiB/TC (v5e/v6e have 128 MiB).
    block_budget = (3 if is_v7 else 4) * 1024 * 1024
    vmem_limit = (56 if is_v7 else 100) * 1024 * 1024

    bytes_per_row = B * L * itemsize
    tile_s_max = max(8, (block_budget // bytes_per_row) // 8 * 8)
    tile_s = min(_round_up(S, 8), tile_s_max)
    num_tiles = _cdiv(S, tile_s)
    # Best effort: even tile count so the "parallel" spatial axis splits
    # evenly across v7x's two TensorCores (redistribute, never add waste).
    if num_tiles > 1 and num_tiles % 2 == 1:
        ts2 = _round_up(_cdiv(S, num_tiles + 1), 8)
        nt2 = _cdiv(S, ts2)
        if nt2 % 2 == 0:
            tile_s, num_tiles = ts2, nt2

    S_pad = tile_s * num_tiles
    HW_pad = S_pad * L

    # --- Layout: free reshape; zero-pad only when the spatial size needs it.
    Cr = C
    if HW_pad != HW:
        if C > 5:                         # about to copy anyway; shrink it
            inp, tgt, Cr = inp[:, :5], tgt[:, :5], 5
        pad = HW_pad - HW
        # finite zeros: padded mask==0 and padded targets==0 -> 0 contribution
        inp = jnp.pad(inp.reshape(B, Cr, HW), ((0, 0), (0, 0), (0, pad)))
        tgt = jnp.pad(tgt.reshape(B, Cr, HW), ((0, 0), (0, 0), (0, pad)))
    # channels >= 5 (if any) are simply never indexed, hence never DMA'd
    inp_r = inp.reshape(B, Cr, S_pad, L)
    tgt_r = tgt.reshape(B, Cr, S_pad, L)

    parts = pl.pallas_call(
        _loc_loss_kernel,
        out_shape=jax.ShapeDtypeStruct((num_tiles, 2, 8, L), jnp.float32),
        grid_spec=pltpu.PrefetchScalarGridSpec(
            num_scalar_prefetch=0,
            grid=(num_tiles, 4),          # (spatial tiles, channels y/x/h/w)
            in_specs=[
                # target channel 0: index map independent of the inner axis,
                # so it is fetched once per spatial tile (no re-DMA per c).
                pl.BlockSpec((B, 1, tile_s, L), lambda i, c: (0, 0, i, 0)),
                # prediction channel c+1 (channel 0 is never streamed)
                pl.BlockSpec((B, 1, tile_s, L), lambda i, c: (0, c + 1, i, 0)),
                # target channel c+1
                pl.BlockSpec((B, 1, tile_s, L), lambda i, c: (0, c + 1, i, 0)),
            ],
            out_specs=pl.BlockSpec((1, 2, 8, L), lambda i, c: (i, 0, 0, 0)),
        ),
        compiler_params=pltpu.CompilerParams(
            dimension_semantics=("parallel", "arbitrary"),
            vmem_limit_bytes=vmem_limit,
        ),
    )(tgt_r, inp_r, tgt_r)

    # Tiny final reduction + normalization; XLA fuses this with the divide.
    total_sq = jnp.sum(parts[:, 0])
    total_mask = jnp.sum(parts[:, 1])
    return total_sq / (total_mask + 1.0) * jnp.asarray(weight, jnp.float32)


def _reference_loss(inp, tgt, weight=1.0):
    # pure-JAX port of the PyTorch forward, for verification
    mask = jnp.where(tgt[:, 0] == 1.0, tgt[:, 0], jnp.zeros_like(tgt[:, 0]))
    in_y = inp[:, 1] * mask
    in_x = inp[:, 2] * mask
    in_h = inp[:, 3] * mask
    in_w = inp[:, 4] * mask
    loss_offset = jnp.sum((in_y - tgt[:, 1]) ** 2) + jnp.sum((in_x - tgt[:, 2]) ** 2)
    p_h = jnp.where(tgt[:, 3] == 0.0, jnp.zeros_like(in_h), in_h)
    p_w = jnp.where(tgt[:, 4] == 0.0, jnp.zeros_like(in_w), in_w)
    loss_box = jnp.sum((p_h - tgt[:, 3]) ** 2) + jnp.sum((p_w - tgt[:, 4]) ** 2)
    denom = jnp.sum(mask) + 1.0
    return (loss_offset + loss_box) / denom * weight


def _make_inputs(key, B, H, W):
    k1, k2, k3, k4 = jax.random.split(key, 4)
    inp = jax.random.normal(k1, (B, 5, H, W), dtype=jnp.float32)
    obj = (jax.random.uniform(k2, (B, H, W)) > 0.5).astype(jnp.float32)
    off = jax.random.normal(k3, (B, 2, H, W), dtype=jnp.float32)
    box = jax.random.normal(k4, (B, 2, H, W), dtype=jnp.float32) * obj[:, None]
    tgt = jnp.concatenate([obj[:, None], off, box], axis=1)
    return inp, tgt


if __name__ == "__main__":
    key = jax.random.PRNGKey(0)
    k_a, k_b = jax.random.split(key)

    # Case 1: spatial size a multiple of 128 (no padding path).
    inp, tgt = _make_inputs(k_a, B=2, H=16, W=16)
    loss = jax.block_until_ready(localization_loss(inp, tgt, weight=1.0))
    ref = jax.block_until_ready(_reference_loss(inp, tgt, weight=1.0))
    assert jnp.allclose(loss, ref, rtol=1e-5, atol=1e-5), (loss, ref)

    # Case 2: odd spatial size (exercises the zero-padding path).
    inp2, tgt2 = _make_inputs(k_b, B=2, H=7, W=9)
    loss2 = jax.block_until_ready(localization_loss(inp2, tgt2, weight=0.5))
    ref2 = jax.block_until_ready(_reference_loss(inp2, tgt2, weight=0.5))
    assert jnp.allclose(loss2, ref2, rtol=1e-5, atol=1e-5), (loss2, ref2)

    print("KERNEL_OK")
</pallas_src>

<mosaic_0001>
module attributes {stable_mosaic.version = 11 : i64} {
  func.func @_loc_loss_kernel(%arg0: i32, %arg1: i32, %arg2: memref<2x1x8x128xf32, #tpu.memory_space<vmem>>, %arg3: memref<2x1x8x128xf32, #tpu.memory_space<vmem>>, %arg4: memref<2x1x8x128xf32, #tpu.memory_space<vmem>>, %arg5: memref<1x2x8x128xf32, #tpu.memory_space<vmem>>) attributes {dimension_semantics = [#tpu.dimension_semantics<parallel>, #tpu.dimension_semantics<arbitrary>], iteration_bounds = array<i64: 1, 4>, scalar_prefetch = 0 : i64, scratch_operands = 0 : i64, tpu.core_type = #tpu.core_type<tc>, window_params = [{transform_indices = @transform_0, window_bounds = array<i64: 2, 1, 8, 128>}, {transform_indices = @transform_1, window_bounds = array<i64: 2, 1, 8, 128>}, {transform_indices = @transform_2, window_bounds = array<i64: 2, 1, 8, 128>}, {transform_indices = @transform_3, window_bounds = array<i64: 1, 2, 8, 128>}]} {
    %c0 = arith.constant 0 : index
    %c0_0 = arith.constant 0 : index
    %c0_1 = arith.constant 0 : index
    %c0_2 = arith.constant 0 : index
    %0 = vector.load %arg2[%c0, %c0_0, %c0_1, %c0_2] : memref<2x1x8x128xf32, #tpu.memory_space<vmem>>, vector<2x1x8x128xf32>
    %1 = vector.shape_cast %0 : vector<2x1x8x128xf32> to vector<2x8x128xf32>
    %cst = arith.constant 1.000000e+00 : f32
    %2 = vector.broadcast %cst : f32 to vector<2x8x128xf32>
    %3 = arith.cmpf oeq, %1, %2 : vector<2x8x128xf32>
    %cst_3 = arith.constant 0.000000e+00 : f32
    %4 = vector.broadcast %cst_3 : f32 to vector<2x8x128xf32>
    %5 = arith.select %3, %1, %4 : vector<2x8x128xi1>, vector<2x8x128xf32>
    %c0_4 = arith.constant 0 : index
    %c0_5 = arith.constant 0 : index
    %c0_6 = arith.constant 0 : index
    %c0_7 = arith.constant 0 : index
    %6 = vector.load %arg4[%c0_4, %c0_5, %c0_6, %c0_7] : memref<2x1x8x128xf32, #tpu.memory_space<vmem>>, vector<2x1x8x128xf32>
    %7 = vector.shape_cast %6 : vector<2x1x8x128xf32> to vector<2x8x128xf32>
    %c0_8 = arith.constant 0 : index
    %c0_9 = arith.constant 0 : index
    %c0_10 = arith.constant 0 : index
    %c0_11 = arith.constant 0 : index
    %8 = vector.load %arg3[%c0_8, %c0_9, %c0_10, %c0_11] : memref<2x1x8x128xf32, #tpu.memory_space<vmem>>, vector<2x1x8x128xf32>
    %9 = vector.shape_cast %8 : vector<2x1x8x128xf32> to vector<2x8x128xf32>
    %10 = arith.mulf %9, %5 : vector<2x8x128xf32>
    %c2_i32 = arith.constant 2 : i32
    %11 = arith.cmpi sge, %arg1, %c2_i32 : i32
    %cst_12 = arith.constant 0.000000e+00 : f32
    %12 = vector.broadcast %cst_12 : f32 to vector<2x8x128xf32>
    %13 = arith.cmpf oeq, %7, %12 : vector<2x8x128xf32>
    %14 = vector.broadcast %11 : i1 to vector<2x8x128xi1>
    %15 = arith.andi %14, %13 : vector<2x8x128xi1>
    %cst_13 = arith.constant 0.000000e+00 : f32
    %16 = vector.broadcast %cst_13 : f32 to vector<2x8x128xf32>
    %17 = arith.select %15, %16, %10 : vector<2x8x128xi1>, vector<2x8x128xf32>
    %18 = arith.subf %17, %7 : vector<2x8x128xf32>
    %19 = arith.mulf %18, %18 : vector<2x8x128xf32>
    %cst_14 = arith.constant dense<0.000000e+00> : vector<8x128xf32>
    %20 = vector.multi_reduction <add>, %19, %cst_14 [0] : vector<2x8x128xf32> to vector<8x128xf32>
    %21 = vector.shape_cast %20 : vector<8x128xf32> to vector<1x8x128xf32>
    %cst_15 = arith.constant dense<0.000000e+00> : vector<8x128xf32>
    %22 = vector.multi_reduction <add>, %21, %cst_15 [0] : vector<1x8x128xf32> to vector<8x128xf32>
    %c0_i32 = arith.constant 0 : i32
    %23 = arith.cmpi eq, %arg1, %c0_i32 : i32
    %24 = arith.extui %23 : i1 to i32
    %c0_i32_16 = arith.constant 0 : i32
    %25 = arith.cmpi ne, %24, %c0_i32_16 : i32
    scf.if %25 {
      %c0_19 = arith.constant 0 : index
      %c0_20 = arith.constant 0 : index
      %c0_21 = arith.constant 0 : index
      %c0_22 = arith.constant 0 : index
      %29 = vector.load %arg5[%c0_19, %c0_20, %c0_21, %c0_22] : memref<1x2x8x128xf32, #tpu.memory_space<vmem>>, vector<1x1x8x128xf32>
      %30 = vector.shape_cast %29 : vector<1x1x8x128xf32> to vector<8x128xf32>
      %31 = vector.shape_cast %22 : vector<8x128xf32> to vector<1x1x8x128xf32>
      tpu.vector_store %arg5[%c0_19, %c0_20, %c0_21, %c0_22], %31 {strides = array<i32>} : memref<1x2x8x128xf32, #tpu.memory_space<vmem>>, vector<1x1x8x128xf32>,
      %cst_23 = arith.constant dense<0.000000e+00> : vector<8x128xf32>
      %32 = vector.multi_reduction <add>, %5, %cst_23 [0] : vector<2x8x128xf32> to vector<8x128xf32>
      %33 = vector.shape_cast %32 : vector<8x128xf32> to vector<1x8x128xf32>
      %cst_24 = arith.constant dense<0.000000e+00> : vector<8x128xf32>
      %34 = vector.multi_reduction <add>, %33, %cst_24 [0] : vector<1x8x128xf32> to vector<8x128xf32>
      %c0_25 = arith.constant 0 : index
      %c1 = arith.constant 1 : index
      %c0_26 = arith.constant 0 : index
      %c0_27 = arith.constant 0 : index
      %35 = vector.load %arg5[%c0_25, %c1, %c0_26, %c0_27] : memref<1x2x8x128xf32, #tpu.memory_space<vmem>>, vector<1x1x8x128xf32>
      %36 = vector.shape_cast %35 : vector<1x1x8x128xf32> to vector<8x128xf32>
      %37 = vector.shape_cast %34 : vector<8x128xf32> to vector<1x1x8x128xf32>
      tpu.vector_store %arg5[%c0_25, %c1, %c0_26, %c0_27], %37 {strides = array<i32>} : memref<1x2x8x128xf32, #tpu.memory_space<vmem>>, vector<1x1x8x128xf32>,
    } else {
    }
    %c0_i32_17 = arith.constant 0 : i32
    %26 = arith.cmpi sgt, %arg1, %c0_i32_17 : i32
    %27 = arith.extui %26 : i1 to i32
    %c0_i32_18 = arith.constant 0 : i32
    %28 = arith.cmpi ne, %27, %c0_i32_18 : i32
    scf.if %28 {
      %c0_19 = arith.constant 0 : index
      %c0_20 = arith.constant 0 : index
      %c0_21 = arith.constant 0 : index
      %c0_22 = arith.constant 0 : index
      %29 = vector.load %arg5[%c0_19, %c0_20, %c0_21, %c0_22] : memref<1x2x8x128xf32, #tpu.memory_space<vmem>>, vector<1x1x8x128xf32>
      %30 = vector.shape_cast %29 : vector<1x1x8x128xf32> to vector<8x128xf32>
      %31 = arith.addf %30, %22 : vector<8x128xf32>
      %c0_23 = arith.constant 0 : index
      %c0_24 = arith.constant 0 : index
      %c0_25 = arith.constant 0 : index
      %c0_26 = arith.constant 0 : index
      %32 = vector.load %arg5[%c0_23, %c0_24, %c0_25, %c0_26] : memref<1x2x8x128xf32, #tpu.memory_space<vmem>>, vector<1x1x8x128xf32>
      %33 = vector.shape_cast %32 : vector<1x1x8x128xf32> to vector<8x128xf32>
      %34 = vector.shape_cast %31 : vector<8x128xf32> to vector<1x1x8x128xf32>
      tpu.vector_store %arg5[%c0_23, %c0_24, %c0_25, %c0_26], %34 {strides = array<i32>} : memref<1x2x8x128xf32, #tpu.memory_space<vmem>>, vector<1x1x8x128xf32>,
    } else {
    }
    return
  }
  func.func @transform_0(%arg0: i32, %arg1: i32) -> (i32, i32, i32, i32) {
    %c0_i32 = arith.constant 0 : i32
    %c0_i32_0 = arith.constant 0 : i32
    %c0_i32_1 = arith.constant 0 : i32
    %c0_i32_2 = arith.constant 0 : i32
    return %c0_i32, %c0_i32_0, %arg0, %c0_i32_1 : i32, i32, i32, i32
  }
  func.func @transform_1(%arg0: i32, %arg1: i32) -> (i32, i32, i32, i32) {
    %c1_i32 = arith.constant 1 : i32
    %0 = arith.addi %arg1, %c1_i32 : i32
    %c0_i32 = arith.constant 0 : i32
    %c0_i32_0 = arith.constant 0 : i32
    %c0_i32_1 = arith.constant 0 : i32
    return %c0_i32, %0, %arg0, %c0_i32_0 : i32, i32, i32, i32
  }
  func.func @transform_2(%arg0: i32, %arg1: i32) -> (i32, i32, i32, i32) {
    %c1_i32 = arith.constant 1 : i32
    %0 = arith.addi %arg1, %c1_i32 : i32
    %c0_i32 = arith.constant 0 : i32
    %c0_i32_0 = arith.constant 0 : i32
    %c0_i32_1 = arith.constant 0 : i32
    return %c0_i32, %0, %arg0, %c0_i32_0 : i32, i32, i32, i32
  }
  func.func @transform_3(%arg0: i32, %arg1: i32) -> (i32, i32, i32, i32) {
    %c0_i32 = arith.constant 0 : i32
    %c0_i32_0 = arith.constant 0 : i32
    %c0_i32_1 = arith.constant 0 : i32
    %c0_i32_2 = arith.constant 0 : i32
    return %arg0, %c0_i32, %c0_i32_0, %c0_i32_1 : i32, i32, i32, i32
  }
}

</mosaic_0001>

<bundles_post_ra>
// kernel: tpu_custom_call.1
= control target key start
LH: loop header
LB: loop body
LE: loop exit
PB: predicated region body
PF: predicated region fallthrough
CT: control target
= control target key end

     0   :  { %8 = vsyncpa [#allocation3], 0  ;;  %s976_s0 = inlined_call_operand.hbm [shape: f32[2,5,8,128], index: 0, kind: input, shape index: {}]   ;;  %s977_s1 = inlined_call_operand.hbm [shape: f32[2,5,8,128], index: 1, kind: input, shape index: {}]   ;;  %s978_s2 = inlined_call_operand.hbm [shape: f32[2,5,8,128], index: 2, kind: input, shape index: {}]   ;;  %s979_s3 = inlined_call_operand.hbm [shape: f32[1,2,8,128], index: 3, kind: output, shape index: {}]  }
   0x1   :  { %9 = vsyncpa [#allocation6], 0 }
   0x2   :  { %11 = vsyncpa [#allocation6 + $0x1], 0 }
   0x3   :  { %12 = vsyncpa [#allocation4], 0  ;;  %s726_s12 = smov 0   ;;  %s728_s13 = smov 0  }
   0x4   :  { %s730_s14 = smov 0   ;;  %s732_s15 = smov 0  }
   0x5   :  { %s734_s16 = smov 0   ;;  %s736_s17 = smov 0  }
   0x6 LB: > { %s27_s18 = sadd.s32 1, %s691_s16  ;;  %s67_s19 = sadd.s32 1, %s683_s14  ;;  %s695_s17 = sphi %s736_s17, %s18_s17   ;;  %s691_s16 = sphi %s734_s16, %s1000_s16   ;;  %s687_s15 = sphi %s732_s15, %s999_s15   ;;  %s683_s14 = sphi %s730_s14, %s998_s14   ;;  %s679_s13 = sphi %s728_s13, %s997_s13   ;;  %s675_s12 = sphi %s726_s12, %s996_s12  }
   0x7   : > { %p28_p0 = scmp.ge.s32.totalorder %s27_s18, 4  ;;  %p74_p1 = scmp.ne.s32.totalorder %s683_s14, %s679_s13 }
   0x8   : > { %p75_p2 = scmp.eq.s32.totalorder %s695_s17, 0  ;;  %p462_p5 = scmp.lt.s32.totalorder %s695_s17, 4 }
   0x9   : > { %s761_s20 = scalar_select %p28_p0, 0, %s27_s18  }
   0xa   : > { %p763_p3 = por %p75_p2, %p74_p1  ;;  %s175_s24 = sand.u32 1, %s695_s17  }
   0xb   : > { %s61_s22 = sadd.s32 1, %s761_s20  ;;  %s177_s25 = sand.u32 1, %s683_s14  }
   0xc   : > { %s62_s23 = ssub.s32 %s27_s18, %s61_s22  ;;  %s424_s27 = sshll.u32 %s177_s25, 4 }
   0xd   : > { %p65_p4 = scmp.eq.s32.totalorder %s62_s23, 0  ;;  %s425_s28 = sshll.u32 %s691_s16, 7 }
   0xe   : > { %s350_s4 = scalar_lea.hbm %s977_s1, %s425_s28  ;;  %s179_s5 = scalar_lea.vmem [#allocation5], %s424_s27 }
   0xf   : > { %s772_s26 = scalar_select %p65_p4, %s683_s14, %s67_s19  }
  0x10   : > { %s187_s6 = sshll.u32 %s179_s5, 4  ;;  %s778_s7 = scalar_lea.hbm %s350_s4, 128  ;;  %s780_s6 = int_to_ptr.vmem [resolvable:$true] %s187_s6 }
  0x11   : > { %p784_p6 = pnand %p462_p5, %p763_p3  ;;  %s791_s11 = scalar_lea.hbm %s978_s2, %s425_s28 }
  0x12   : > { %s201_s18 = scalar_lea.vmem [#allocation7], %s424_s27  ;;  %s796_s22 = scalar_lea.hbm %s791_s11, 128 }
  0x13   : > { %s793_s19 = sshll.u32 %s201_s18, 4  ;;  %s798_s23 = scalar_lea.sflag [#allocation6], %s175_s24  ;;  %s829_s19 = int_to_ptr.vmem [resolvable:$true] %s793_s19 }
  0x14   : > { %s551_s21 = scalar_lea.hbm %s350_s4, 384  ;;  %p523_p8 = pneg %p784_p6 }
  0x15   : > { %p522_p7 = scmp.ne.s32.totalorder %s778_s7, %s551_s21  ;;  %s526_s28 = scalar_lea.hbm %s977_s1, 1280 }
  0x16   : > { %p527_p11 = scmp.lt.u32.totalorder %s778_s7, %s977_s1  ;;  %p528_p12 = scmp.lt.u32.totalorder %s526_s28, %s551_s21 }
  0x17   : > { %p524_p9 = pnand %p523_p8, %p522_p7  ;;  %p530_p0 = scmp.lt.u32.totalorder %s551_s21, %s778_s7 }
  0x18   : > { %p529_p13 = por %p528_p12, %p527_p11 }
  0x19   : > { %p525_p10 = pneg %p524_p9 }
  0x1a   : > { %p531_p1 = por %p530_p0, %p529_p13 }
  0x1c   : > { %p532_p2 = pnand %p531_p1, %p525_p10 }
  0x1e   : > { %535 = shalt.err (!%p532_p2)
}
  0x1f   : > { %s536_s24 = scalar_lea.vmem %s780_s6, 256  ;;  %s697_s4 = smov [#allocation5]  }
  0x20   : > { %p537_p3 = scmp.ne.s32.totalorder %s780_s6, %s536_s24  ;;  %s541_s5 = sshll.u32 %s697_s4, 4  ;;  %s542_s5 = int_to_ptr.vmem [resolvable:$false] %s541_s5 }
  0x21   : > { %s543_s9 = scalar_lea.vmem %s542_s5, 512  ;;  %p544_p7 = scmp.lt.s32.totalorder %s780_s6, %s542_s5 }
  0x22   : > { %p539_p4 = pnand %p537_p3, %p523_p8  ;;  %p545_p9 = scmp.lt.s32.totalorder %s543_s9, %s536_s24 }
  0x24   : > { %p540_p5 = pneg %p539_p4  ;;  %p546_p11 = por %p545_p9, %p544_p7 }
  0x26   : > { %p547_p12 = pnand %p546_p11, %p540_p5 }
  0x28   : > { %550 = shalt.err (!%p547_p12)
}
  0x29   : > { %s698_s10 = smov 640   ;;  %s699_s18 = smov 128  }
  0x2a   : > { %s700_s21 = smov 8   ;;  %s832_s25 = sadd.s32 4294967295, %s695_s17  }
  0x2b   : > { %457 = dma.hbm_to_vmem [thread:$0]  (!%p784_p6), %s778_s7, 256, %s780_s6, %s798_s23, %s698_s10, %s699_s18, %s700_s21  }
  0x2c   : > { %p80_p10 = scmp.ne.s32.totalorder %s679_s13, %s675_s12  ;;  %p980_p13 = scmp.eq.s32.totalorder %s832_s25, 0 }
  0x2d   : > { %p421_p0 = scmp.ge.s32.totalorder %s695_s17, 1  ;;  %p147_p1 = scmp.lt.s32.totalorder %s695_s17, 5 }
  0x2e   : > { %p841_p2 = por %p980_p13, %p80_p10  ;;  %s701_s6 = smov [#allocation2]  }
  0x2f   : > { %p845_p3 = pnand %p421_p0, %p147_p1  ;;  %s849_s7 = sshll.u32 %s701_s6, 4  ;;  %s162_s7 = int_to_ptr.vmem [resolvable:$true] %s849_s7 }
  0x30   : > { %s985_s29 = scalar_select %p841_p2, 1, 0 }
  0x31   : > { %s986_s28 = scalar_select %p845_p3, 1, 0 }
  0x32   : > { %s582_s12 = scalar_lea.hbm %s791_s11, 384  ;;  %s557_s24 = scalar_lea.hbm %s978_s2, 1280 }
  0x33   : > { %p553_p5 = scmp.ne.s32.totalorder %s796_s22, %s582_s12  ;;  %p558_p11 = scmp.lt.u32.totalorder %s796_s22, %s978_s2 }
  0x34   : > { %p559_p12 = scmp.lt.u32.totalorder %s557_s24, %s582_s12  ;;  %p561_p0 = scmp.lt.u32.totalorder %s582_s12, %s796_s22 }
  0x35   : > { %p555_p7 = pnand %p553_p5, %p523_p8 }
  0x36   : > { %p560_p10 = por %p559_p12, %p558_p11 }
  0x37   : > { %p556_p9 = pneg %p555_p7 }
  0x38   : > { %p562_p1 = por %p561_p0, %p560_p10 }
  0x3a   : > { %p563_p13 = pnand %p562_p1, %p556_p9 }
  0x3c   : > { %566 = shalt.err (!%p563_p13)
}
  0x3d   : > { %s567_s11 = scalar_lea.vmem %s829_s19, 256  ;;  %s702_s9 = smov [#allocation7]  }
  0x3e   : > { %p568_p5 = scmp.ne.s32.totalorder %s829_s19, %s567_s11  ;;  %s572_s6 = sshll.u32 %s702_s9, 4  ;;  %s573_s6 = int_to_ptr.vmem [resolvable:$false] %s572_s6 }
  0x3f   : > { %s574_s30 = scalar_lea.vmem %s573_s6, 512  ;;  %p575_p2 = scmp.lt.s32.totalorder %s829_s19, %s573_s6 }
  0x40   : > { %p570_p7 = pnand %p568_p5, %p523_p8  ;;  %p576_p11 = scmp.lt.s32.totalorder %s574_s30, %s567_s11 }
  0x42   : > { %p571_p4 = pneg %p570_p7  ;;  %p577_p12 = por %p576_p11, %p575_p2 }
  0x44   : > { %p578_p10 = pnand %p577_p12, %p571_p4 }
  0x46   : > { %581 = shalt.err (!%p578_p10)
}
  0x47   : > { %460 = dma.hbm_to_vmem [thread:$0]  (!%p784_p6), %s796_s22, 256, %s829_s19, %s798_s23, %s698_s10, %s699_s18, %s700_s21  }
  0x48   : > { %p987_p8 = scmp.eq.s32.totalorder %s832_s25, 0  ;;  %p988_p13 = pneg %p845_p3 }
  0x49   : > { %s583_s24 = scalar_lea.hbm %s976_s0, 256  ;;  %s588_s23 = scalar_lea.hbm %s976_s0, 1280 }
  0x4a   : > { %p886_p9 = pnand %p988_p13, %p987_p8  ;;  %p584_p2 = scmp.ne.s32.totalorder %s976_s0, %s583_s24 }
  0x4b   : > { %p589_p1 = scmp.lt.u32.totalorder %s588_s23, %s583_s24  ;;  %p590_p5 = scmp.lt.u32.totalorder %s583_s24, %s976_s0 }
  0x4c   : > { %p585_p4 = pneg %p886_p9 }
  0x4d   : > { %p591_p7 = por %p590_p5, %p589_p1 }
  0x4e   : > { %p586_p6 = pnand %p585_p4, %p584_p2 }
  0x50   : > { %p587_p0 = pneg %p586_p6 }
  0x52   : > { %p592_p11 = pnand %p591_p7, %p587_p0 }
  0x54   : > { %595 = shalt.err (!%p592_p11)
}
  0x55   : > { %s596_s6 = scalar_lea.vmem %s162_s7, 256  ;;  %p604_p13 = scmp.lt.s32.totalorder %s162_s7, %s162_s7 }
  0x56   : > { %p597_p12 = scmp.ne.s32.totalorder %s162_s7, %s596_s6  ;;  %p605_p3 = scmp.lt.s32.totalorder %s596_s6, %s596_s6 }
  0x58   : > { %p599_p10 = pnand %p597_p12, %p585_p4  ;;  %p606_p2 = por %p605_p3, %p604_p13 }
  0x5a   : > { %p600_p8 = pneg %p599_p10 }
  0x5c   : > { %p607_p6 = pnand %p606_p2, %p600_p8 }
  0x5e   : > { %610 = shalt.err (!%p607_p6)
}
  0x5f   : > { %453 = dma.hbm_to_vmem [thread:$0]  (!%p886_p9), %s976_s0, 256, %s162_s7, [#allocation3], %s698_s10, %s699_s18, %s700_s21  }
  0x60   : > { %p990_p0 = scmp.ne.s32.totalorder %s986_s28, 0 }
  0x61   : > { %p991_p4 = scmp.eq.s32.totalorder (!%p990_p0), %s832_s25, 0 }
  0x62   : > { %221 = sbr.rel (%p990_p0) target bundleno = 163 (0xa3), region = 32 }
  0x69   : > { %662 = dma.done.wait (%p991_p4), [#allocation3], 256   ;;  %p992_p1 = pmov %p991_p4 }
  0x6a   : > { %s227_s12 = sand.u32 1, %s832_s25   ;;  %s229_s8 = sand.u32 1, %s679_s13  }
  0x6b   : > { %664 = vsyncadd (%p992_p1), [#allocation3], 4294967040  ;;  %s430_s24 = sshll.u32 %s229_s8, 4  ;;  %s228_s4 = scalar_lea.sflag [#allocation6], %s227_s12 }
  0x6c   : > { %s231_s5 = scalar_lea.vmem [#allocation5], %s430_s24  ;;  %p993_p3 = scmp.ne.s32.totalorder %s985_s29, 0 }
  0x6e   : > { %666 = dma.done.wait (%p993_p3), %s228_s4, 512  }
  0x6f   : > { %668 = vsyncadd (%p993_p3), %s228_s4, 4294966784  ;;  %p277_p9 = scmp.ge.s32.totalorder %s687_s15, 2  ;;  %v265_v2 = vld [vmem:[#allocation2] sm:$0xff]  ;;  %v266_v3 = vld [vmem:[#allocation2 + $0x8] sm:$0xff]  ;;  %s240_s18 = scalar_lea.vmem [#allocation7], %s430_s24 }
  0x70   : > { %v271_v4 = vld [vmem:[%s240_s18] sm:$0xff]  ;;  %vm267_vm1 = vcmp.eq.f32.partialorder %v265_v2, 1.0  ;;  %vm268_vm2 = vcmp.eq.f32.partialorder %v266_v3, 1.0  ;;  %v272_v5 = vld [vmem:[%s240_s18 + $0x8] sm:$0xff]  ;;  %p432_p5 = scmp.ne.s32.totalorder %s687_s15, 0 }
  0x71   : > { %s280_s10 = scalar_select %p277_p9, 1, 0  ;;  %v273_v6 = vld [vmem:[%s231_s5] sm:$0xff]  ;;  %v274_v7 = vld [vmem:[%s231_s5 + $0x8] sm:$0xff]  ;;  %vm278_vm3 = vcmp.eq.f32.partialorder %v271_v4, 0.0  ;;  %v269_v8 = vsel %vm267_vm1, %v265_v2, 0.0 }
  0x72   : > { %v270_v9 = vsel %vm268_vm2, %v266_v3, 0.0  ;;  %vm279_vm4 = vcmp.eq.f32.partialorder %v272_v5, 0.0  ;;  %v275_v10 = vmul.f32 %v273_v6, %v269_v8 }
  0x73   : > { %v281_v0 = vstv %s280_s10  ;;  %v276_v11 = vmul.f32 %v274_v7, %v270_v9  ;;  %v298_v19 = vadd.f32 (!%p432_p5), %v270_v9, %v269_v8 }
  0x74   : > { %vm925_vm0 = vcmp.eq.s32.totalorder %v281_v0, 1 }
  0x75   : > { %vm283_vm5 = vmand %vm925_vm0, %vm278_vm3  ;;  %301 = vst [vmem:[#allocation8 + $0x8] sm:$0xff] (!%p432_p5), %v298_v19 }
  0x76   : > { %vm284_vm6 = vmand %vm925_vm0, %vm279_vm4  ;;  %v285_v12 = vsel %vm283_vm5, 0.0, %v275_v10  ;;  %296 = sbr.rel (%p432_p5) target bundleno = 127 (0x7f), region = 48 }
  0x77   : > { %v286_v13 = vsel %vm284_vm6, 0.0, %v276_v11  ;;  %v287_v14 = vsub.f32 %v285_v12, %v271_v4 }
  0x78   : > { %v288_v15 = vsub.f32 %v286_v13, %v272_v5 }
  0x79   : > { %v289_v16 = vmul.f32 %v287_v14, %v287_v14 }
  0x7a   : > { %v290_v17 = vmul.f32 %v288_v15, %v288_v15 }
  0x7c   : > { %v291_v18 = vadd.f32 %v290_v17, %v289_v16 }
  0x7e   : > { %297 = vst [vmem:[#allocation8] sm:$0xff] %v291_v18 }
  0x7f PF: > { %p433_p7 = scmp.le.s32.totalorder %s687_s15, 0 }
  0x81   : > { %305 = sbr.rel (%p433_p7) target bundleno = 137 (0x89), region = 52 }
  0x85   : > { %v306_v20 = vld [vmem:[#allocation8] sm:$0xff] (!%p433_p7) }
  0x86   : > { %v307_v21 = vadd.f32 (!%p433_p7), %v306_v20, %v291_v18 }
  0x88   : > { %308 = vst [vmem:[#allocation8] sm:$0xff] %v307_v21 }
  0x89 PF: > { %p464_p11 = scmp.eq.s32.totalorder %s832_s25, 3  ;;  %s703_s21 = smov [#allocation8]  }
  0x8a   : > { %s318_s29 = sshll.u32 %s703_s21, 4  ;;  %s319_s29 = int_to_ptr.vmem [resolvable:$true] %s318_s29 }
  0x8b   : > { %s611_s28 = scalar_lea.vmem %s319_s29, 256  ;;  %p618_p13 = scmp.lt.s32.totalorder %s319_s29, %s319_s29 }
  0x8c   : > { %p612_p12 = scmp.ne.s32.totalorder %s319_s29, %s611_s28  ;;  %p619_p2 = scmp.lt.s32.totalorder %s611_s28, %s611_s28 }
  0x8e   : > { %p613_p10 = pnand %p612_p12, %p464_p11  ;;  %p620_p6 = por %p619_p2, %p618_p13 }
  0x90   : > { %p614_p8 = pneg %p613_p10 }
  0x92   : > { %p621_p0 = pnand %p620_p6, %p614_p8 }
  0x94   : > { %624 = shalt.err (!%p621_p0)
}
  0x95   : > { %s625_s19 = scalar_lea.hbm %s979_s3, 256 }
  0x96   : > { %p626_p4 = scmp.ne.s32.totalorder %s979_s3, %s625_s19  ;;  %p631_p9 = scmp.lt.u32.totalorder %s625_s19, %s979_s3 }
  0x98   : > { %p627_p1 = pnand %p626_p4, %p464_p11 }
  0x9a   : > { %p628_p3 = pneg %p627_p1 }
  0x9c   : > { %p633_p5 = pnand %p631_p9, %p628_p3 }
  0x9e   : > { %636 = shalt.err (!%p633_p5)
}
  0x9f   : > { %s704_s6 = smov 128   ;;  %s705_s30 = smov 8  }
  0xa0   : > { %447 = dma.vmem_to_hbm [thread:$0]  (%p464_p11), %s319_s29, 256, %s979_s3, [#allocation4], %s704_s6, %s704_s6, %s705_s30  }
  0xa1   : > { %670 = dma.done.wait (%p464_p11), [#allocation4], 256  }
  0xa2   : > { %672 = vsyncadd (%p464_p11), [#allocation4], 4294967040 }
  0xa3 PF: > { %s18_s17 = sadd.s32 1, %s695_s17   ;;  %s996_s12 = smov %s679_s13 }
  0xa4   : > { %p15_p7 = scmp.ge.s32.totalorder %s18_s17, 6   ;;  %s997_s13 = smov %s683_s14 }
  0xa5   : > { %s998_s14 = smov %s772_s26  ;;  %s999_s15 = smov %s691_s16 }
  0xa6   : > { %s1000_s16 = smov %s761_s20  ;;  %17 = sbr.rel (!%p15_p7) target bundleno = 6 (0x6), region = 96 }
  0xad   :  { %334 = vsyncpa [#allocation3], 1 }
  0xae   :  { %336 = vsyncpa [#allocation3 + $0x1], 1 }
  0xaf   :  { %337 = vsyncpa [#allocation6], 1 }
  0xb0   :  { %339 = vsyncpa [#allocation6 + $0x1], 1 }
  0xb1   :  { %340 = vsyncpa [#allocation4], 1 }
  0xb2   :  { %342 = vsyncpa [#allocation4 + $0x1], 1 }

</bundles_post_ra>
